<compile_context>
chip_gen: v7x
topology: tpu7x:2x2x1
jax: 0.10.0
libtpu: 0.0.40
codegen_flags: <defaults>
</compile_context>

<pallas_src>
import functools

import jax
import jax.numpy as jnp
from jax import lax
from jax.experimental import pallas as pl
from jax.experimental.pallas import tpu as pltpu

_LANE = 128


def _round_up(x, m):
    return m * pl.cdiv(x, m)


def _is_multi_tensorcore():
    """True on chips with >1 TensorCore fed from one grid (v4 / v5p / v7x)."""
    try:
        kind = jax.devices()[0].device_kind.lower()
    except Exception:
        return False
    return any(tag in kind for tag in ("v4", "v5p", "v7"))


def _vmem_cap_bytes():
    """Per-chip VMEM ceiling with headroom (v7x: 64 MiB/TC, v5e/v6e: 128 MiB)."""
    try:
        cap = int(pltpu.get_tpu_info().vmem_capacity_bytes)
    except Exception:
        cap = 64 * 1024 * 1024  # conservative: assume v7x
    return (cap * 7) // 8


def _choose_tm(B, multi_tc):
    """Batch tile.  One tile for small batches on 1-TC chips (the grid is a
    serial loop; splitting only adds per-step overhead).  On multi-TC chips
    force >=2 steps so both cores get work.  Large batches use 512-row tiles
    (multiple of the 256-wide MXU)."""
    if B <= 8:
        return _round_up(max(B, 1), 8)
    tm = min(512, _round_up(B, 8))
    if multi_tc and B >= 16 and pl.cdiv(B, tm) < 2:
        tm = _round_up(pl.cdiv(B, 2), 8)
    return tm


def _choose_tn(Np, w_itemsize):
    """out_features tile: full width for small N, otherwise a 128-multiple tile
    so the weight never has to be fully VMEM-resident."""
    if Np <= 512:
        return Np
    tn = 512
    while tn > 128 and 2 * tn * Np * w_itemsize > 16 * 1024 * 1024:
        tn //= 2
    return tn


def score_block_kernel(x_ref, w_ref, b_ref, o_ref):
    # x_ref: (tm, Np)  w_ref: (tn, Np) -- PyTorch (out, in) layout, no transpose
    # b_ref: (1, tn)   o_ref: (tm, tn)
    x = x_ref[...]
    w = w_ref[...]
    if x.dtype != w.dtype:
        # Weight was pre-cast (e.g. bf16) once in the wrapper; feed the MXU at
        # that precision.  Accumulation below stays f32.
        x = x.astype(w.dtype)
    # y = x @ W.T : contract x's last axis with the weight's last axis.
    y = lax.dot_general(
        x, w,
        dimension_numbers=(((1,), (1,)), ((), ())),
        preferred_element_type=jnp.float32,
    )
    y = y + b_ref[...]                         # f32 bias, broadcast over rows
    o_ref[...] = jnp.maximum(y, 0.0).astype(o_ref.dtype)


@functools.partial(
    jax.jit,
    static_argnames=("tm", "tn", "vmem_limit", "single_buffer_consts"))
def _score_block_impl(x, weight, bias, *, tm, tn, vmem_limit,
                      single_buffer_consts):
    B, Np = x.shape
    b2d = bias.reshape(1, Np).astype(jnp.float32)

    ni = pl.cdiv(B, tm)
    nj = pl.cdiv(Np, tn)
    grid = (ni, nj)

    if nj == 1 and single_buffer_consts:
        # Block index never changes -> single-buffer weight/bias (halves their
        # VMEM footprint vs the default double-buffering).
        w_spec = pl.BlockSpec((tn, Np), lambda i, j: (0, 0),
                              pipeline_mode=pl.Buffered(1))
        b_spec = pl.BlockSpec((1, tn), lambda i, j: (0, 0),
                              pipeline_mode=pl.Buffered(1))
    else:
        w_spec = pl.BlockSpec((tn, Np), lambda i, j: (j, 0))
        b_spec = pl.BlockSpec((1, tn), lambda i, j: (0, j))

    return pl.pallas_call(
        score_block_kernel,
        out_shape=jax.ShapeDtypeStruct((B, Np), x.dtype),
        grid_spec=pltpu.PrefetchScalarGridSpec(
            num_scalar_prefetch=0,
            grid=grid,
            in_specs=[
                pl.BlockSpec((tm, Np), lambda i, j: (i, 0)),  # x: resident over j
                w_spec,                                        # weight row tile
                b_spec,                                        # bias tile
            ],
            out_specs=pl.BlockSpec((tm, tn), lambda i, j: (i, j)),
        ),
        compiler_params=pltpu.CompilerParams(
            dimension_semantics=("parallel", "parallel"),
            vmem_limit_bytes=vmem_limit,
        ),
    )(x, weight, b2d)


def score_block(x, weight, bias, *, tm=None, tn=None, mxu_dtype=None):
    """y = relu(x @ weight.T + bias), matching torch.nn.Linear + ReLU.

    x:      (B, N)
    weight: (N, N)  -- PyTorch layout (out_features, in_features)
    bias:   (N,)
    mxu_dtype: optional lower-precision MXU input dtype (e.g. jnp.bfloat16).
               The weight is cast once here; accum + bias/ReLU stay f32.
    """
    B, N = x.shape
    assert weight.shape == (N, N) and bias.shape == (N,)

    # Lane-align N: pad once, slice the output (keeps stores lane-dense and
    # satisfies the (8,128) BlockSpec constraint).
    Np = _round_up(N, _LANE)
    if Np != N:
        x = jnp.pad(x, ((0, 0), (0, Np - N)))
        weight = jnp.pad(weight, ((0, Np - N), (0, Np - N)))
        bias = jnp.pad(bias, (0, Np - N))

    if mxu_dtype is not None and weight.dtype != mxu_dtype:
        weight = weight.astype(mxu_dtype)     # pre-cast once (HBM + VMEM win)

    if tm is None:
        tm = _choose_tm(B, _is_multi_tensorcore())
    w_item = jnp.dtype(weight.dtype).itemsize
    if tn is None:
        tn = _choose_tn(Np, w_item)

    nj = pl.cdiv(Np, tn)
    x_item = jnp.dtype(x.dtype).itemsize
    w_bufs = 1 if nj == 1 else 2
    vmem_est = (2 * tm * Np * x_item          # x (double-buffered)
                + w_bufs * tn * Np * w_item   # weight tile(s)
                + w_bufs * tn * 4             # bias (f32)
                + 2 * tm * tn * x_item)       # output (double-buffered)
    vmem_limit = int(min(max(int(vmem_est * 1.5) + (4 << 20), 32 << 20),
                         _vmem_cap_bytes()))

    try:
        out = _score_block_impl(x, weight, bias, tm=tm, tn=tn,
                                vmem_limit=vmem_limit,
                                single_buffer_consts=True)
    except Exception:
        # Fallback if this JAX build rejects pl.Buffered(1) on inputs.
        out = _score_block_impl(x, weight, bias, tm=tm, tn=tn,
                                vmem_limit=vmem_limit,
                                single_buffer_consts=False)

    if Np != N:
        out = out[:, :N]
    return out


def _reference(x, weight, bias):
    return jnp.maximum(x @ weight.T + bias, 0.0)


if __name__ == "__main__":
    key = jax.random.PRNGKey(0)
    k_x1, k_w1, k_b1, k_x2, k_w3, k_b3, k_x3 = jax.random.split(key, 7)

    def make_params(kw, kb, n):
        bound = 1.0 / jnp.sqrt(jnp.float32(n))
        w = jax.random.uniform(kw, (n, n), jnp.float32, -bound, bound)
        b = jax.random.uniform(kb, (n,), jnp.float32, -bound, bound)
        return w, b

    # Case 1: lane-aligned nunits, small batch.
    N, B = 128, 64
    w1, b1 = make_params(k_w1, k_b1, N)
    x1 = jax.random.normal(k_x1, (B, N), jnp.float32)
    o1 = jax.block_until_ready(score_block(x1, w1, b1))
    assert o1.shape == (B, N)
    assert jnp.allclose(o1, _reference(x1, w1, b1), atol=1e-5, rtol=1e-5)

    # Case 2: ragged batch (partial tiles computed and masked off by Pallas).
    x2 = jax.random.normal(k_x2, (20, N), jnp.float32)
    o2 = jax.block_until_ready(score_block(x2, w1, b1))
    assert o2.shape == (20, N)
    assert jnp.allclose(o2, _reference(x2, w1, b1), atol=1e-5, rtol=1e-5)

    # Case 3: nunits not a multiple of 128 -> padded internally, output sliced.
    N3, B3 = 32, 8
    w3, b3 = make_params(k_w3, k_b3, N3)
    x3 = jax.random.normal(k_x3, (B3, N3), jnp.float32)
    o3 = jax.block_until_ready(score_block(x3, w3, b3))
    assert o3.shape == (B3, N3)
    assert jnp.allclose(o3, _reference(x3, w3, b3), atol=1e-5, rtol=1e-5)

    # Case 4: bf16 MXU inputs (weight pre-cast once), f32 accumulate/epilogue.
    o4 = jax.block_until_ready(score_block(x1, w1, b1, mxu_dtype=jnp.bfloat16))
    assert jnp.allclose(o4, _reference(x1, w1, b1), atol=5e-2, rtol=5e-2)

    # Case 5: nunits > tn -> out_features grid axis (weight never fully resident).
    k_w5, k_b5, k_x5 = jax.random.split(jax.random.PRNGKey(1), 3)
    N5, B5 = 640, 16
    w5, b5 = make_params(k_w5, k_b5, N5)
    x5 = jax.random.normal(k_x5, (B5, N5), jnp.float32)
    o5 = jax.block_until_ready(score_block(x5, w5, b5))
    assert o5.shape == (B5, N5)
    assert jnp.allclose(o5, _reference(x5, w5, b5), atol=1e-4, rtol=1e-4)

    print("KERNEL_OK")
</pallas_src>

<mosaic_0001>
module attributes {stable_mosaic.version = 11 : i64} {
  func.func @score_block_kernel(%arg0: i32, %arg1: i32, %arg2: memref<64x128xf32, #tpu.memory_space<vmem>>, %arg3: memref<128x128xf32, #tpu.memory_space<vmem>>, %arg4: memref<1x128xf32, #tpu.memory_space<vmem>>, %arg5: memref<64x128xf32, #tpu.memory_space<vmem>>) attributes {dimension_semantics = [#tpu.dimension_semantics<parallel>, #tpu.dimension_semantics<parallel>], iteration_bounds = array<i64: 1, 1>, scalar_prefetch = 0 : i64, scratch_operands = 0 : i64, tpu.core_type = #tpu.core_type<tc>, window_params = [{transform_indices = @transform_0, window_bounds = array<i64: 64, 128>}, {pipeline_mode = #tpu.pipeline_mode<synchronous>, transform_indices = @transform_1, window_bounds = array<i64: 128, 128>}, {pipeline_mode = #tpu.pipeline_mode<synchronous>, transform_indices = @transform_2, window_bounds = array<i64: 1, 128>}, {transform_indices = @transform_3, window_bounds = array<i64: 64, 128>}]} {
    %c0 = arith.constant 0 : index
    %c0_0 = arith.constant 0 : index
    %0 = vector.load %arg2[%c0, %c0_0] : memref<64x128xf32, #tpu.memory_space<vmem>>, vector<64x128xf32>
    %c0_1 = arith.constant 0 : index
    %c0_2 = arith.constant 0 : index
    %1 = vector.load %arg3[%c0_1, %c0_2] : memref<128x128xf32, #tpu.memory_space<vmem>>, vector<128x128xf32>
    %cst = arith.constant dense<0.000000e+00> : vector<64x128xf32>
    %2 = tpu.matmul %0, %1, %cst {dimension_numbers = #tpu.dot_dimension_numbers<[1], [1], [0], [0], [0, 0, 1, 0], [], []>} : vector<64x128xf32>, vector<128x128xf32>, vector<64x128xf32> -> vector<64x128xf32>
    %c0_3 = arith.constant 0 : index
    %c0_4 = arith.constant 0 : index
    %3 = vector.load %arg4[%c0_3, %c0_4] : memref<1x128xf32, #tpu.memory_space<vmem>>, vector<1x128xf32>
    %4 = vector.broadcast %3 : vector<1x128xf32> to vector<64x128xf32>
    %5 = arith.addf %2, %4 : vector<64x128xf32>
    %cst_5 = arith.constant 0.000000e+00 : f32
    %6 = vector.broadcast %cst_5 : f32 to vector<64x128xf32>
    %7 = arith.maximumf %5, %6 : vector<64x128xf32>
    %c0_6 = arith.constant 0 : index
    %c0_7 = arith.constant 0 : index
    %8 = vector.load %arg5[%c0_6, %c0_7] : memref<64x128xf32, #tpu.memory_space<vmem>>, vector<64x128xf32>
    tpu.vector_store %arg5[%c0_6, %c0_7], %7 {strides = array<i32>} : memref<64x128xf32, #tpu.memory_space<vmem>>, vector<64x128xf32>,
    return
  }
  func.func @transform_0(%arg0: i32, %arg1: i32) -> (i32, i32) {
    %c0_i32 = arith.constant 0 : i32
    %c0_i32_0 = arith.constant 0 : i32
    return %arg0, %c0_i32 : i32, i32
  }
  func.func @transform_1(%arg0: i32, %arg1: i32) -> (i32, i32) {
    %c0_i32 = arith.constant 0 : i32
    %c0_i32_0 = arith.constant 0 : i32
    %c0_i32_1 = arith.constant 0 : i32
    return %c0_i32, %c0_i32_0 : i32, i32
  }
  func.func @transform_2(%arg0: i32, %arg1: i32) -> (i32, i32) {
    %c0_i32 = arith.constant 0 : i32
    %c0_i32_0 = arith.constant 0 : i32
    %c0_i32_1 = arith.constant 0 : i32
    return %c0_i32, %c0_i32_0 : i32, i32
  }
  func.func @transform_3(%arg0: i32, %arg1: i32) -> (i32, i32) {
    %c0_i32 = arith.constant 0 : i32
    return %arg0, %arg1 : i32, i32
  }
}

module attributes {stable_mosaic.version = 11 : i64} {
  func.func @score_block_kernel(%arg0: i32, %arg1: i32, %arg2: memref<64x128xf32, #tpu.memory_space<vmem>>, %arg3: memref<128x128xf32, #tpu.memory_space<vmem>>, %arg4: memref<1x128xf32, #tpu.memory_space<vmem>>, %arg5: memref<64x128xf32, #tpu.memory_space<vmem>>) attributes {dimension_semantics = [#tpu.dimension_semantics<parallel>, #tpu.dimension_semantics<parallel>], iteration_bounds = array<i64: 1, 1>, scalar_prefetch = 0 : i64, scratch_operands = 0 : i64, tpu.core_type = #tpu.core_type<tc>, window_params = [{transform_indices = @transform_0, window_bounds = array<i64: 64, 128>}, {transform_indices = @transform_1, window_bounds = array<i64: 128, 128>}, {transform_indices = @transform_2, window_bounds = array<i64: 1, 128>}, {transform_indices = @transform_3, window_bounds = array<i64: 64, 128>}]} {
    %c0 = arith.constant 0 : index
    %c0_0 = arith.constant 0 : index
    %0 = vector.load %arg2[%c0, %c0_0] : memref<64x128xf32, #tpu.memory_space<vmem>>, vector<64x128xf32>
    %c0_1 = arith.constant 0 : index
    %c0_2 = arith.constant 0 : index
    %1 = vector.load %arg3[%c0_1, %c0_2] : memref<128x128xf32, #tpu.memory_space<vmem>>, vector<128x128xf32>
    %cst = arith.constant dense<0.000000e+00> : vector<64x128xf32>
    %2 = tpu.matmul %0, %1, %cst {dimension_numbers = #tpu.dot_dimension_numbers<[1], [1], [0], [0], [0, 0, 1, 0], [], []>} : vector<64x128xf32>, vector<128x128xf32>, vector<64x128xf32> -> vector<64x128xf32>
    %c0_3 = arith.constant 0 : index
    %c0_4 = arith.constant 0 : index
    %3 = vector.load %arg4[%c0_3, %c0_4] : memref<1x128xf32, #tpu.memory_space<vmem>>, vector<1x128xf32>
    %4 = vector.broadcast %3 : vector<1x128xf32> to vector<64x128xf32>
    %5 = arith.addf %2, %4 : vector<64x128xf32>
    %cst_5 = arith.constant 0.000000e+00 : f32
    %6 = vector.broadcast %cst_5 : f32 to vector<64x128xf32>
    %7 = arith.maximumf %5, %6 : vector<64x128xf32>
    %c0_6 = arith.constant 0 : index
    %c0_7 = arith.constant 0 : index
    %8 = vector.load %arg5[%c0_6, %c0_7] : memref<64x128xf32, #tpu.memory_space<vmem>>, vector<64x128xf32>
    tpu.vector_store %arg5[%c0_6, %c0_7], %7 {strides = array<i32>} : memref<64x128xf32, #tpu.memory_space<vmem>>, vector<64x128xf32>,
    return
  }
  func.func @transform_0(%arg0: i32, %arg1: i32) -> (i32, i32) {
    %c0_i32 = arith.constant 0 : i32
    %c0_i32_0 = arith.constant 0 : i32
    return %arg0, %c0_i32 : i32, i32
  }
  func.func @transform_1(%arg0: i32, %arg1: i32) -> (i32, i32) {
    %c0_i32 = arith.constant 0 : i32
    %c0_i32_0 = arith.constant 0 : i32
    return %arg1, %c0_i32 : i32, i32
  }
  func.func @transform_2(%arg0: i32, %arg1: i32) -> (i32, i32) {
    %c0_i32 = arith.constant 0 : i32
    %c0_i32_0 = arith.constant 0 : i32
    return %c0_i32, %arg1 : i32, i32
  }
  func.func @transform_3(%arg0: i32, %arg1: i32) -> (i32, i32) {
    %c0_i32 = arith.constant 0 : i32
    return %arg0, %arg1 : i32, i32
  }
}

</mosaic_0001>

<bundles_post_ra>
// kernel: _score_block_impl.1
= control target key start
LH: loop header
LB: loop body
LE: loop exit
PB: predicated region body
PF: predicated region fallthrough
CT: control target
= control target key end

     0   :  { %8 = vsyncpa [#allocation3], 0  ;;  %s480_s0 = inlined_call_operand.hbm [shape: f32[64,128], index: 0, kind: input, shape index: {}]   ;;  %s481_s1 = inlined_call_operand.hbm [shape: f32[128,128], index: 1, kind: input, shape index: {}]   ;;  %s482_s2 = inlined_call_operand.vmem [shape: f32[1,128], index: 2, kind: input, shape index: {}]   ;;  %s483_s3 = inlined_call_operand.hbm [shape: f32[64,128], index: 3, kind: output, shape index: {}]  }
   0x1   :  { %9 = vsyncpa [#allocation6], 0 }
   0x2   :  { %10 = vsyncpa [#allocation4], 0  ;;  %s407_s12 = smov [#allocation2]   ;;  %s335_s16 = scalar_lea.hbm %s480_s0, 1024 }
   0x3   :  { %s16_s13 = sshll.u32 %s407_s12, 4  ;;  %p336_p0 = scmp.ne.s32.totalorder %s480_s0, %s335_s16  ;;  %s17_s13 = int_to_ptr.vmem [resolvable:$true] %s16_s13 }
   0x4   :  { %p339_p1 = scmp.lt.u32.totalorder %s335_s16, %s480_s0 }
   0x6   :  { %p341_p2 = pnand %p339_p1, %p336_p0 }
   0x8   :  { %344 = shalt.err (!%p341_p2)
}
   0x9   :  { %s345_s21 = scalar_lea.vmem %s17_s13, 1024  ;;  %p350_p4 = scmp.lt.s32.totalorder %s17_s13, %s17_s13 }
   0xa   :  { %p346_p3 = scmp.ne.s32.totalorder %s17_s13, %s345_s21  ;;  %p351_p5 = scmp.lt.s32.totalorder %s345_s21, %s345_s21 }
   0xc   :  { %p352_p6 = por %p351_p5, %p350_p4 }
   0xe   :  { %p353_p7 = pnand %p352_p6, %p346_p3 }
  0x10   :  { %356 = shalt.err (!%p353_p7)
}
  0x11   :  { %s408_s22 = smov 128   ;;  %s409_s23 = smov 8  }
  0x12   :  { %22 = dma.hbm_to_vmem [thread:$0]  %s480_s0, 1024, %s17_s13, [#allocation3], %s408_s22, %s408_s22, %s409_s23  }
  0x13   :  { %s410_s26 = smov [#allocation5]   ;;  %s357_s30 = scalar_lea.hbm %s481_s1, 2048 }
  0x14   :  { %s28_s27 = sshll.u32 %s410_s26, 4  ;;  %p358_p8 = scmp.ne.s32.totalorder %s481_s1, %s357_s30  ;;  %s29_s27 = int_to_ptr.vmem [resolvable:$true] %s28_s27 }
  0x15   :  { %p361_p9 = scmp.lt.u32.totalorder %s357_s30, %s481_s1 }
  0x17   :  { %p363_p10 = pnand %p361_p9, %p358_p8 }
  0x19   :  { %366 = shalt.err (!%p363_p10)
}
  0x1a   :  { %s367_s8 = scalar_lea.vmem %s29_s27, 2048  ;;  %p372_p12 = scmp.lt.s32.totalorder %s29_s27, %s29_s27 }
  0x1b   :  { %p368_p11 = scmp.ne.s32.totalorder %s29_s27, %s367_s8  ;;  %p373_p13 = scmp.lt.s32.totalorder %s367_s8, %s367_s8 }
  0x1d   :  { %p374_p0 = por %p373_p13, %p372_p12 }
  0x1f   :  { %p375_p1 = pnand %p374_p0, %p368_p11 }
  0x21   :  { %378 = shalt.err (!%p375_p1)
}
  0x22   :  { %34 = dma.hbm_to_vmem [thread:$0]  %s481_s1, 2048, %s29_s27, [#allocation6], %s408_s22, %s408_s22, %s409_s23  }
  0x23   :  { %401 = dma.done.wait [#allocation3], 1024  }
  0x24   :  { %402 = vsyncadd [#allocation3], 4294966272 }
  0x25   :  { %403 = dma.done.wait [#allocation6], 2048  }
  0x26   :  { %404 = vsyncadd [#allocation6], 4294965248  ;;  %v51_v0 = vld [vmem:[#allocation5] sm:$0xff]  ;;  %v52_v1 = vld [vmem:[#allocation5 + $0x8] sm:$0xff] }
  0x27   :  { %v53_v2 = vld [vmem:[#allocation5 + $0x10] sm:$0xff]  ;;  %v282_v3 = vpack.c.bf16 %v52_v1, %v51_v0  ;;  %v54_v4 = vld [vmem:[#allocation5 + $0x18] sm:$0xff]  ;;  %v43_v6 = vld [vmem:[#allocation2] sm:$0xff] }
  0x28   :  { %v286_v5 = vpack.c.bf16 %v54_v4, %v53_v2  ;;  %v47_v7 = vld [vmem:[#allocation2 + $0x20] sm:$0xff]  ;;  %v56_v9 = vld [vmem:[#allocation5 + $0x28] sm:$0xff]  ;;  %270 = vmatprep.mubr.f32.mxu0 %v43_v6  ;;  %v57_v11 = vld [vmem:[#allocation5 + $0x30] sm:$0xff] }
  0x29   :  { %283 = vmatprep.subr.bf16.mxu0 %v282_v3  ;;  %314 = vmatprep.subr.bf16.mxu1 %v282_v3  ;;  %v55_v8 = vld [vmem:[#allocation5 + $0x20] sm:$0xff]  ;;  %v58_v12 = vld [vmem:[#allocation5 + $0x38] sm:$0xff]  ;;  %v60_v15 = vld [vmem:[#allocation5 + $0x48] sm:$0xff] }
  0x2a   :  { %285 = vmatpush3.bf16.xpose.msra.mxu0 %v282_v3  ;;  %322 = vmatpush3.bf16.xpose.msra.mxu1 %v282_v3  ;;  %v290_v10 = vpack.c.bf16 %v56_v9, %v55_v8  ;;  %v294_v13 = vpack.c.bf16 %v58_v12, %v57_v11  ;;  %v59_v14 = vld [vmem:[#allocation5 + $0x40] sm:$0xff]  ;;  %v61_v17 = vld [vmem:[#allocation5 + $0x50] sm:$0xff]  ;;  %v62_v18 = vld [vmem:[#allocation5 + $0x58] sm:$0xff] }
  0x2b   :  { %287 = vmatprep.subr.bf16.mxu0 %v286_v5  ;;  %315 = vmatprep.subr.bf16.mxu1 %v286_v5  ;;  %v298_v16 = vpack.c.bf16 %v60_v15, %v59_v14  ;;  %v302_v19 = vpack.c.bf16 %v62_v18, %v61_v17  ;;  %v63_v20 = vld [vmem:[#allocation5 + $0x60] sm:$0xff]  ;;  %v64_v21 = vld [vmem:[#allocation5 + $0x68] sm:$0xff]  ;;  %v65_v23 = vld [vmem:[#allocation5 + $0x70] sm:$0xff] }
  0x2c   :  { %276 = vmatprep.mubr.f32.mxu1 %v47_v7  ;;  %v306_v22 = vpack.c.bf16 %v64_v21, %v63_v20  ;;  %v66_v24 = vld [vmem:[#allocation5 + $0x78] sm:$0xff]  ;;  %v44_v26 = vld [vmem:[#allocation2 + $0x8] sm:$0xff]  ;;  %v45_v28 = vld [vmem:[#allocation2 + $0x10] sm:$0xff] }
  0x2d   :  { %v310_v25 = vpack.c.bf16 %v66_v24, %v65_v23  ;;  %v48_v27 = vld [vmem:[#allocation2 + $0x28] sm:$0xff]  ;;  %v49_v29 = vld [vmem:[#allocation2 + $0x30] sm:$0xff]  ;;  %v46_v30 = vld [vmem:[#allocation2 + $0x18] sm:$0xff] }
  0x2e   :  { %v50_v31 = vld [vmem:[#allocation2 + $0x38] sm:$0xff]  ;;  %v213_v32 = vld [vmem:[%s482_s2] ss:$0 sm:$0xff]  ;;  %s411_s2 = smov [#allocation7]  }
  0x2f   :  { %s200_s11 = sshll.u32 %s411_s2, 4  ;;  %s201_s11 = int_to_ptr.vmem [resolvable:$true] %s200_s11 }
  0x30   :  { %s379_s12 = scalar_lea.vmem %s201_s11, 1024  ;;  %p384_p3 = scmp.lt.s32.totalorder %s201_s11, %s201_s11 }
  0x31   :  { %p380_p2 = scmp.ne.s32.totalorder %s201_s11, %s379_s12  ;;  %p385_p4 = scmp.lt.s32.totalorder %s379_s12, %s379_s12 }
  0x32   :  { %289 = vmatpush3.bf16.xpose.msra.mxu0 %v286_v5  ;;  %323 = vmatpush3.bf16.xpose.msra.mxu1 %v286_v5 }
  0x33   :  { %291 = vmatprep.subr.bf16.mxu0 %v290_v10  ;;  %316 = vmatprep.subr.bf16.mxu1 %v290_v10  ;;  %p386_p5 = por %p385_p4, %p384_p3 }
  0x35   :  { %p387_p6 = pnand %p386_p5, %p380_p2 }
  0x3a   :  { %293 = vmatpush3.bf16.xpose.msra.mxu0 %v290_v10  ;;  %324 = vmatpush3.bf16.xpose.msra.mxu1 %v290_v10 }
  0x3b   :  { %295 = vmatprep.subr.bf16.mxu0 %v294_v13  ;;  %317 = vmatprep.subr.bf16.mxu1 %v294_v13 }
  0x42   :  { %297 = vmatpush3.bf16.xpose.msra.mxu0 %v294_v13  ;;  %325 = vmatpush3.bf16.xpose.msra.mxu1 %v294_v13 }
  0x43   :  { %299 = vmatprep.subr.bf16.mxu0 %v298_v16  ;;  %318 = vmatprep.subr.bf16.mxu1 %v298_v16 }
  0x4a   :  { %301 = vmatpush3.bf16.xpose.msra.mxu0 %v298_v16  ;;  %326 = vmatpush3.bf16.xpose.msra.mxu1 %v298_v16 }
  0x4b   :  { %303 = vmatprep.subr.bf16.mxu0 %v302_v19  ;;  %319 = vmatprep.subr.bf16.mxu1 %v302_v19 }
  0x52   :  { %305 = vmatpush3.bf16.xpose.msra.mxu0 %v302_v19  ;;  %327 = vmatpush3.bf16.xpose.msra.mxu1 %v302_v19 }
  0x53   :  { %307 = vmatprep.subr.bf16.mxu0 %v306_v22  ;;  %320 = vmatprep.subr.bf16.mxu1 %v306_v22 }
  0x5a   :  { %309 = vmatpush3.bf16.xpose.msra.mxu0 %v306_v22  ;;  %328 = vmatpush3.bf16.xpose.msra.mxu1 %v306_v22 }
  0x5b   :  { %311 = vmatprep.subr.bf16.mxu0 %v310_v25  ;;  %321 = vmatprep.subr.bf16.mxu1 %v310_v25 }
  0x62   :  { %313 = vmatpush3.bf16.xpose.msra.mxu0 %v310_v25  ;;  %329 = vmatpush3.bf16.xpose.msra.mxu1 %v310_v25 }
  0x69   :  { %271 = vmatmul.mubr.f32.vlgmr.msra.gmra.mrb[0].mxu0 %v44_v26  ;;  %277 = vmatmul.mubr.f32.vlgmr.msra.gmra.mrb[0].mxu1 %v48_v27 }
  0x6a   :  { %273 = vmatprep.mubr.f32.mxu0 %v45_v28  ;;  %279 = vmatprep.mubr.f32.mxu1 %v49_v29 }
  0x6d   :  { %274 = vmatmul.mubr.f32.gmra.mrb[2].mxu0 %v46_v30  ;;  %280 = vmatmul.mubr.f32.gmra.mrb[2].mxu1 %v50_v31 }
 0x13c   :  { %v272_v33 = vpop.f32.mrb[0].mxu0  ;;  %v278_v34 = vpop.f32.mrb[0].mxu1 }
 0x13d   :  { %v146_v35 = vadd.f32 %v272_v33, %v213_v32  ;;  %v166_v36 = vadd.f32 %v278_v34, %v213_v32  ;;  %v140_v37 = vpop.f32.mrb[1].mxu0  ;;  %v160_v38 = vpop.f32.mrb[1].mxu1 }
 0x13e   :  { %v141_v39 = vadd.f32 %v213_v32, %v140_v37  ;;  %v161_v40 = vadd.f32 %v213_v32, %v160_v38 }
 0x13f   :  { %v180_v41 = vmax.f32 %v146_v35, 0.0  ;;  %v184_v42 = vmax.f32 %v166_v36, 0.0 }
 0x140   :  { %v179_v43 = vmax.f32 %v141_v39, 0.0  ;;  %v183_v44 = vmax.f32 %v161_v40, 0.0  ;;  %v275_v45 = vpop.f32.mrb[2].mxu0  ;;  %v281_v46 = vpop.f32.mrb[2].mxu1 }
 0x141   :  { %188 = vst [vmem:[#allocation7 + $0x8] sm:$0xff] %v180_v41  ;;  %192 = vst [vmem:[#allocation7 + $0x28] sm:$0xff] %v184_v42  ;;  %v156_v47 = vadd.f32 %v275_v45, %v213_v32  ;;  %v176_v48 = vadd.f32 %v281_v46, %v213_v32  ;;  %v150_v49 = vpop.f32.mrb[3].mxu0  ;;  %v170_v50 = vpop.f32.mrb[3].mxu1 }
 0x142   :  { %187 = vst [vmem:[#allocation7] sm:$0xff] %v179_v43  ;;  %191 = vst [vmem:[#allocation7 + $0x20] sm:$0xff] %v183_v44  ;;  %v151_v51 = vadd.f32 %v213_v32, %v150_v49  ;;  %v171_v52 = vadd.f32 %v213_v32, %v170_v50 }
 0x143   :  { %v182_v53 = vmax.f32 %v156_v47, 0.0  ;;  %v186_v54 = vmax.f32 %v176_v48, 0.0 }
 0x144   :  { %v181_v55 = vmax.f32 %v151_v51, 0.0  ;;  %v185_v56 = vmax.f32 %v171_v52, 0.0 }
 0x145   :  { %190 = vst [vmem:[#allocation7 + $0x18] sm:$0xff] %v182_v53  ;;  %194 = vst [vmem:[#allocation7 + $0x38] sm:$0xff] %v186_v54 }
 0x146   :  { %189 = vst [vmem:[#allocation7 + $0x10] sm:$0xff] %v181_v55  ;;  %193 = vst [vmem:[#allocation7 + $0x30] sm:$0xff] %v185_v56 }
 0x147   :  { %390 = shalt.err (!%p387_p6)
}
 0x148   :  { %s391_s15 = scalar_lea.hbm %s483_s3, 1024 }
 0x149   :  { %p392_p7 = scmp.ne.s32.totalorder %s483_s3, %s391_s15  ;;  %p395_p8 = scmp.lt.u32.totalorder %s391_s15, %s483_s3 }
 0x14b   :  { %p397_p9 = pnand %p395_p8, %p392_p7 }
 0x14d   :  { %400 = shalt.err (!%p397_p9)
}
 0x14e   :  { %206 = dma.vmem_to_hbm [thread:$0]  %s201_s11, 1024, %s483_s3, [#allocation4], %s408_s22, %s408_s22, %s409_s23  }
 0x14f   :  { %405 = dma.done.wait [#allocation4], 1024  }
 0x150   :  { %406 = vsyncadd [#allocation4], 4294966272 }
 0x151   :  { %210 = vsyncpa [#allocation3], 1 }
 0x152   :  { %211 = vsyncpa [#allocation6], 1 }
 0x153   :  { %212 = vsyncpa [#allocation4], 1 }

// kernel: _score_block_impl.1
= control target key start
LH: loop header
LB: loop body
LE: loop exit
PB: predicated region body
PF: predicated region fallthrough
CT: control target
= control target key end

     0   :  { %8 = vsyncpa [#allocation3], 0  ;;  %s480_s0 = inlined_call_operand.hbm [shape: f32[64,128], index: 0, kind: input, shape index: {}]   ;;  %s481_s1 = inlined_call_operand.hbm [shape: f32[128,128], index: 1, kind: input, shape index: {}]   ;;  %s482_s2 = inlined_call_operand.vmem [shape: f32[1,128], index: 2, kind: input, shape index: {}]   ;;  %s483_s3 = inlined_call_operand.hbm [shape: f32[64,128], index: 3, kind: output, shape index: {}]  }
   0x1   :  { %9 = vsyncpa [#allocation6], 0 }
   0x2   :  { %10 = vsyncpa [#allocation4], 0  ;;  %s407_s12 = smov [#allocation2]   ;;  %s335_s16 = scalar_lea.hbm %s480_s0, 1024 }
   0x3   :  { %s16_s13 = sshll.u32 %s407_s12, 4  ;;  %p336_p0 = scmp.ne.s32.totalorder %s480_s0, %s335_s16  ;;  %s17_s13 = int_to_ptr.vmem [resolvable:$true] %s16_s13 }
   0x4   :  { %p339_p1 = scmp.lt.u32.totalorder %s335_s16, %s480_s0 }
   0x6   :  { %p341_p2 = pnand %p339_p1, %p336_p0 }
   0x8   :  { %344 = shalt.err (!%p341_p2)
}
   0x9   :  { %s345_s21 = scalar_lea.vmem %s17_s13, 1024  ;;  %p350_p4 = scmp.lt.s32.totalorder %s17_s13, %s17_s13 }
   0xa   :  { %p346_p3 = scmp.ne.s32.totalorder %s17_s13, %s345_s21  ;;  %p351_p5 = scmp.lt.s32.totalorder %s345_s21, %s345_s21 }
   0xc   :  { %p352_p6 = por %p351_p5, %p350_p4 }
   0xe   :  { %p353_p7 = pnand %p352_p6, %p346_p3 }
  0x10   :  { %356 = shalt.err (!%p353_p7)
}
  0x11   :  { %s408_s22 = smov 128   ;;  %s409_s23 = smov 8  }
  0x12   :  { %22 = dma.hbm_to_vmem [thread:$0]  %s480_s0, 1024, %s17_s13, [#allocation3], %s408_s22, %s408_s22, %s409_s23  }
  0x13   :  { %s410_s26 = smov [#allocation5]   ;;  %s357_s30 = scalar_lea.hbm %s481_s1, 2048 }
  0x14   :  { %s28_s27 = sshll.u32 %s410_s26, 4  ;;  %p358_p8 = scmp.ne.s32.totalorder %s481_s1, %s357_s30  ;;  %s29_s27 = int_to_ptr.vmem [resolvable:$true] %s28_s27 }
  0x15   :  { %p361_p9 = scmp.lt.u32.totalorder %s357_s30, %s481_s1 }
  0x17   :  { %p363_p10 = pnand %p361_p9, %p358_p8 }
  0x19   :  { %366 = shalt.err (!%p363_p10)
}
  0x1a   :  { %s367_s8 = scalar_lea.vmem %s29_s27, 2048  ;;  %p372_p12 = scmp.lt.s32.totalorder %s29_s27, %s29_s27 }
  0x1b   :  { %p368_p11 = scmp.ne.s32.totalorder %s29_s27, %s367_s8  ;;  %p373_p13 = scmp.lt.s32.totalorder %s367_s8, %s367_s8 }
  0x1d   :  { %p374_p0 = por %p373_p13, %p372_p12 }
  0x1f   :  { %p375_p1 = pnand %p374_p0, %p368_p11 }
  0x21   :  { %378 = shalt.err (!%p375_p1)
}
  0x22   :  { %34 = dma.hbm_to_vmem [thread:$0]  %s481_s1, 2048, %s29_s27, [#allocation6], %s408_s22, %s408_s22, %s409_s23  }
  0x23   :  { %401 = dma.done.wait [#allocation3], 1024  }
  0x24   :  { %402 = vsyncadd [#allocation3], 4294966272 }
  0x25   :  { %403 = dma.done.wait [#allocation6], 2048  }
  0x26   :  { %404 = vsyncadd [#allocation6], 4294965248  ;;  %v51_v0 = vld [vmem:[#allocation5] sm:$0xff]  ;;  %v52_v1 = vld [vmem:[#allocation5 + $0x8] sm:$0xff] }
  0x27   :  { %v53_v2 = vld [vmem:[#allocation5 + $0x10] sm:$0xff]  ;;  %v282_v3 = vpack.c.bf16 %v52_v1, %v51_v0  ;;  %v54_v4 = vld [vmem:[#allocation5 + $0x18] sm:$0xff]  ;;  %v43_v6 = vld [vmem:[#allocation2] sm:$0xff] }
  0x28   :  { %v286_v5 = vpack.c.bf16 %v54_v4, %v53_v2  ;;  %v47_v7 = vld [vmem:[#allocation2 + $0x20] sm:$0xff]  ;;  %v56_v9 = vld [vmem:[#allocation5 + $0x28] sm:$0xff]  ;;  %270 = vmatprep.mubr.f32.mxu0 %v43_v6  ;;  %v57_v11 = vld [vmem:[#allocation5 + $0x30] sm:$0xff] }
  0x29   :  { %283 = vmatprep.subr.bf16.mxu0 %v282_v3  ;;  %314 = vmatprep.subr.bf16.mxu1 %v282_v3  ;;  %v55_v8 = vld [vmem:[#allocation5 + $0x20] sm:$0xff]  ;;  %v58_v12 = vld [vmem:[#allocation5 + $0x38] sm:$0xff]  ;;  %v60_v15 = vld [vmem:[#allocation5 + $0x48] sm:$0xff] }
  0x2a   :  { %285 = vmatpush3.bf16.xpose.msra.mxu0 %v282_v3  ;;  %322 = vmatpush3.bf16.xpose.msra.mxu1 %v282_v3  ;;  %v290_v10 = vpack.c.bf16 %v56_v9, %v55_v8  ;;  %v294_v13 = vpack.c.bf16 %v58_v12, %v57_v11  ;;  %v59_v14 = vld [vmem:[#allocation5 + $0x40] sm:$0xff]  ;;  %v61_v17 = vld [vmem:[#allocation5 + $0x50] sm:$0xff]  ;;  %v62_v18 = vld [vmem:[#allocation5 + $0x58] sm:$0xff] }
  0x2b   :  { %287 = vmatprep.subr.bf16.mxu0 %v286_v5  ;;  %315 = vmatprep.subr.bf16.mxu1 %v286_v5  ;;  %v298_v16 = vpack.c.bf16 %v60_v15, %v59_v14  ;;  %v302_v19 = vpack.c.bf16 %v62_v18, %v61_v17  ;;  %v63_v20 = vld [vmem:[#allocation5 + $0x60] sm:$0xff]  ;;  %v64_v21 = vld [vmem:[#allocation5 + $0x68] sm:$0xff]  ;;  %v65_v23 = vld [vmem:[#allocation5 + $0x70] sm:$0xff] }
  0x2c   :  { %276 = vmatprep.mubr.f32.mxu1 %v47_v7  ;;  %v306_v22 = vpack.c.bf16 %v64_v21, %v63_v20  ;;  %v66_v24 = vld [vmem:[#allocation5 + $0x78] sm:$0xff]  ;;  %v44_v26 = vld [vmem:[#allocation2 + $0x8] sm:$0xff]  ;;  %v45_v28 = vld [vmem:[#allocation2 + $0x10] sm:$0xff] }
  0x2d   :  { %v310_v25 = vpack.c.bf16 %v66_v24, %v65_v23  ;;  %v48_v27 = vld [vmem:[#allocation2 + $0x28] sm:$0xff]  ;;  %v49_v29 = vld [vmem:[#allocation2 + $0x30] sm:$0xff]  ;;  %v46_v30 = vld [vmem:[#allocation2 + $0x18] sm:$0xff] }
  0x2e   :  { %v50_v31 = vld [vmem:[#allocation2 + $0x38] sm:$0xff]  ;;  %v213_v32 = vld [vmem:[%s482_s2] ss:$0 sm:$0xff]  ;;  %s411_s2 = smov [#allocation7]  }
  0x2f   :  { %s200_s11 = sshll.u32 %s411_s2, 4  ;;  %s201_s11 = int_to_ptr.vmem [resolvable:$true] %s200_s11 }
  0x30   :  { %s379_s12 = scalar_lea.vmem %s201_s11, 1024  ;;  %p384_p3 = scmp.lt.s32.totalorder %s201_s11, %s201_s11 }
  0x31   :  { %p380_p2 = scmp.ne.s32.totalorder %s201_s11, %s379_s12  ;;  %p385_p4 = scmp.lt.s32.totalorder %s379_s12, %s379_s12 }
  0x32   :  { %289 = vmatpush3.bf16.xpose.msra.mxu0 %v286_v5  ;;  %323 = vmatpush3.bf16.xpose.msra.mxu1 %v286_v5 }
  0x33   :  { %291 = vmatprep.subr.bf16.mxu0 %v290_v10  ;;  %316 = vmatprep.subr.bf16.mxu1 %v290_v10  ;;  %p386_p5 = por %p385_p4, %p384_p3 }
  0x35   :  { %p387_p6 = pnand %p386_p5, %p380_p2 }
  0x3a   :  { %293 = vmatpush3.bf16.xpose.msra.mxu0 %v290_v10  ;;  %324 = vmatpush3.bf16.xpose.msra.mxu1 %v290_v10 }
  0x3b   :  { %295 = vmatprep.subr.bf16.mxu0 %v294_v13  ;;  %317 = vmatprep.subr.bf16.mxu1 %v294_v13 }
  0x42   :  { %297 = vmatpush3.bf16.xpose.msra.mxu0 %v294_v13  ;;  %325 = vmatpush3.bf16.xpose.msra.mxu1 %v294_v13 }
  0x43   :  { %299 = vmatprep.subr.bf16.mxu0 %v298_v16  ;;  %318 = vmatprep.subr.bf16.mxu1 %v298_v16 }
  0x4a   :  { %301 = vmatpush3.bf16.xpose.msra.mxu0 %v298_v16  ;;  %326 = vmatpush3.bf16.xpose.msra.mxu1 %v298_v16 }
  0x4b   :  { %303 = vmatprep.subr.bf16.mxu0 %v302_v19  ;;  %319 = vmatprep.subr.bf16.mxu1 %v302_v19 }
  0x52   :  { %305 = vmatpush3.bf16.xpose.msra.mxu0 %v302_v19  ;;  %327 = vmatpush3.bf16.xpose.msra.mxu1 %v302_v19 }
  0x53   :  { %307 = vmatprep.subr.bf16.mxu0 %v306_v22  ;;  %320 = vmatprep.subr.bf16.mxu1 %v306_v22 }
  0x5a   :  { %309 = vmatpush3.bf16.xpose.msra.mxu0 %v306_v22  ;;  %328 = vmatpush3.bf16.xpose.msra.mxu1 %v306_v22 }
  0x5b   :  { %311 = vmatprep.subr.bf16.mxu0 %v310_v25  ;;  %321 = vmatprep.subr.bf16.mxu1 %v310_v25 }
  0x62   :  { %313 = vmatpush3.bf16.xpose.msra.mxu0 %v310_v25  ;;  %329 = vmatpush3.bf16.xpose.msra.mxu1 %v310_v25 }
  0x69   :  { %271 = vmatmul.mubr.f32.vlgmr.msra.gmra.mrb[0].mxu0 %v44_v26  ;;  %277 = vmatmul.mubr.f32.vlgmr.msra.gmra.mrb[0].mxu1 %v48_v27 }
  0x6a   :  { %273 = vmatprep.mubr.f32.mxu0 %v45_v28  ;;  %279 = vmatprep.mubr.f32.mxu1 %v49_v29 }
  0x6d   :  { %274 = vmatmul.mubr.f32.gmra.mrb[2].mxu0 %v46_v30  ;;  %280 = vmatmul.mubr.f32.gmra.mrb[2].mxu1 %v50_v31 }
 0x13c   :  { %v272_v33 = vpop.f32.mrb[0].mxu0  ;;  %v278_v34 = vpop.f32.mrb[0].mxu1 }
 0x13d   :  { %v146_v35 = vadd.f32 %v272_v33, %v213_v32  ;;  %v166_v36 = vadd.f32 %v278_v34, %v213_v32  ;;  %v140_v37 = vpop.f32.mrb[1].mxu0  ;;  %v160_v38 = vpop.f32.mrb[1].mxu1 }
 0x13e   :  { %v141_v39 = vadd.f32 %v213_v32, %v140_v37  ;;  %v161_v40 = vadd.f32 %v213_v32, %v160_v38 }
 0x13f   :  { %v180_v41 = vmax.f32 %v146_v35, 0.0  ;;  %v184_v42 = vmax.f32 %v166_v36, 0.0 }
 0x140   :  { %v179_v43 = vmax.f32 %v141_v39, 0.0  ;;  %v183_v44 = vmax.f32 %v161_v40, 0.0  ;;  %v275_v45 = vpop.f32.mrb[2].mxu0  ;;  %v281_v46 = vpop.f32.mrb[2].mxu1 }
 0x141   :  { %188 = vst [vmem:[#allocation7 + $0x8] sm:$0xff] %v180_v41  ;;  %192 = vst [vmem:[#allocation7 + $0x28] sm:$0xff] %v184_v42  ;;  %v156_v47 = vadd.f32 %v275_v45, %v213_v32  ;;  %v176_v48 = vadd.f32 %v281_v46, %v213_v32  ;;  %v150_v49 = vpop.f32.mrb[3].mxu0  ;;  %v170_v50 = vpop.f32.mrb[3].mxu1 }
 0x142   :  { %187 = vst [vmem:[#allocation7] sm:$0xff] %v179_v43  ;;  %191 = vst [vmem:[#allocation7 + $0x20] sm:$0xff] %v183_v44  ;;  %v151_v51 = vadd.f32 %v213_v32, %v150_v49  ;;  %v171_v52 = vadd.f32 %v213_v32, %v170_v50 }
 0x143   :  { %v182_v53 = vmax.f32 %v156_v47, 0.0  ;;  %v186_v54 = vmax.f32 %v176_v48, 0.0 }
 0x144   :  { %v181_v55 = vmax.f32 %v151_v51, 0.0  ;;  %v185_v56 = vmax.f32 %v171_v52, 0.0 }
 0x145   :  { %190 = vst [vmem:[#allocation7 + $0x18] sm:$0xff] %v182_v53  ;;  %194 = vst [vmem:[#allocation7 + $0x38] sm:$0xff] %v186_v54 }
 0x146   :  { %189 = vst [vmem:[#allocation7 + $0x10] sm:$0xff] %v181_v55  ;;  %193 = vst [vmem:[#allocation7 + $0x30] sm:$0xff] %v185_v56 }
 0x147   :  { %390 = shalt.err (!%p387_p6)
}
 0x148   :  { %s391_s15 = scalar_lea.hbm %s483_s3, 1024 }
 0x149   :  { %p392_p7 = scmp.ne.s32.totalorder %s483_s3, %s391_s15  ;;  %p395_p8 = scmp.lt.u32.totalorder %s391_s15, %s483_s3 }
 0x14b   :  { %p397_p9 = pnand %p395_p8, %p392_p7 }
 0x14d   :  { %400 = shalt.err (!%p397_p9)
}
 0x14e   :  { %206 = dma.vmem_to_hbm [thread:$0]  %s201_s11, 1024, %s483_s3, [#allocation4], %s408_s22, %s408_s22, %s409_s23  }
 0x14f   :  { %405 = dma.done.wait [#allocation4], 1024  }
 0x150   :  { %406 = vsyncadd [#allocation4], 4294966272 }
 0x151   :  { %210 = vsyncpa [#allocation3], 1 }
 0x152   :  { %211 = vsyncpa [#allocation6], 1 }
 0x153   :  { %212 = vsyncpa [#allocation4], 1 }

</bundles_post_ra>
